<compile_context>
chip_gen: v7x
topology: tpu7x:2x2x1
jax: 0.10.0
libtpu: 0.0.40
codegen_flags: <defaults>
</compile_context>

<pallas_src>
import functools

import jax
import jax.numpy as jnp
from jax.experimental import pallas as pl
from jax.experimental.pallas import tpu as pltpu


def _qnet_kernel(x_ref, w1_ref, b1_ref, w2_ref, b2_ref, w3_ref, b3_ref, o_ref):
    # Matmuls hit the MXU in the weights' dtype (bf16) with f32 accumulation;
    # bias-add + ReLU stay f32 on the VPU (v5e has no bf16 VALU path).
    x = x_ref[...].astype(w1_ref.dtype)
    h1 = jnp.dot(x, w1_ref[...], preferred_element_type=jnp.float32) + b1_ref[...]
    h1 = jnp.maximum(h1, 0.0)
    h2 = jnp.dot(h1.astype(w2_ref.dtype), w2_ref[...],
                 preferred_element_type=jnp.float32) + b2_ref[...]
    h2 = jnp.maximum(h2, 0.0)
    o = jnp.dot(h2.astype(w3_ref.dtype), w3_ref[...],
                preferred_element_type=jnp.float32) + b3_ref[...]
    o_ref[...] = o.astype(o_ref.dtype)


def prepare_qnetwork_params(w1, b1, w2, b2, w3, b3, *, weight_dtype=jnp.bfloat16):
    """One-time parameter prep, hoisted out of the per-call path.

    Weights are [in, out] (transposed vs. torch.nn.Linear) cast to `weight_dtype`
    (bf16 by default -> full-rate MXU path, half the weight DMA bytes).  Biases stay
    f32 as [1, out] so the bias/ReLU epilogue is f32 on the VPU.
    """
    prep_w = lambda w: jnp.asarray(w, weight_dtype)
    prep_b = lambda b: jnp.asarray(b, jnp.float32).reshape(1, -1)
    return (prep_w(w1), prep_b(b1), prep_w(w2), prep_b(b2), prep_w(w3), prep_b(b3))


@functools.lru_cache(maxsize=None)
def _default_tiling():
    """(block_b, vmem_limit_bytes), sized per TPU generation."""
    block_b, vmem = 8192, 64 << 20          # v5e / v6e: 128 MiB physical VMEM
    try:
        kind = jax.devices()[0].device_kind.lower()
        if "v7" in kind or "7x" in kind:
            block_b, vmem = 4096, 48 << 20  # v7x: only 64 MiB VMEM per TensorCore
    except Exception:
        block_b, vmem = 4096, 48 << 20      # unknown backend: conservative but still big tiles
    return block_b, vmem


def _round_up(x, m):
    return ((x + m - 1) // m) * m


def _cost_estimate(B, S, H1, H2, A, param_bytes):
    flops = 2 * B * (S * H1 + H1 * H2 + H2 * A) + B * (H1 + H2 + A)
    bytes_accessed = B * S * 4 + B * A * 4 + param_bytes
    return pl.CostEstimate(flops=flops, transcendentals=0, bytes_accessed=bytes_accessed)


@functools.partial(jax.jit, static_argnames=("block_b", "vmem_limit_bytes"))
def qnetwork_forward(x, params, *, block_b=None, vmem_limit_bytes=None):
    """x: [B, state_size] float32; params from prepare_qnetwork_params.
    Returns [B, action_size] float32."""
    w1, b1, w2, b2, w3, b3 = params
    B, S = x.shape
    H1, H2 = w1.shape[1], w2.shape[1]
    A = w3.shape[1]

    if block_b is None or vmem_limit_bytes is None:
        auto_block, auto_vmem = _default_tiling()
        block_b = auto_block if block_b is None else block_b
        vmem_limit_bytes = auto_vmem if vmem_limit_bytes is None else vmem_limit_bytes

    param_bytes = sum(int(p.size) * p.dtype.itemsize for p in params)
    cost = _cost_estimate(B, S, H1, H2, A, param_bytes)

    if B <= block_b:
        # Small/medium batch: one program, every operand VMEM-resident, no grid, no padding.
        vmem = pl.BlockSpec(memory_space=pltpu.MemorySpace.VMEM)
        return pl.pallas_call(
            _qnet_kernel,
            out_shape=jax.ShapeDtypeStruct((B, A), jnp.float32),
            in_specs=[vmem] * 7,
            out_specs=vmem,
            compiler_params=pltpu.CompilerParams(vmem_limit_bytes=vmem_limit_bytes),
            cost_estimate=cost,
        )(x, w1, b1, w2, b2, w3, b3)

    # Large batch: tile the batch dimension.  No wrapper pad/slice — Pallas masks the ragged
    # last tile's writeback.  Tiles are balanced so there are always >= 2 roughly-equal tiles
    # for the "parallel" axis (keeps both v7x TensorCores busy); weights/biases use constant
    # index_maps so they stay VMEM-resident across tiles.
    block = min(block_b, _round_up(pl.cdiv(B, 2), 8))
    n_tiles = pl.cdiv(B, block)

    const = lambda i: (0, 0)
    return pl.pallas_call(
        _qnet_kernel,
        out_shape=jax.ShapeDtypeStruct((B, A), jnp.float32),
        grid=(n_tiles,),
        in_specs=[
            pl.BlockSpec((block, S), lambda i: (i, 0)),
            pl.BlockSpec(w1.shape, const),
            pl.BlockSpec(b1.shape, const),
            pl.BlockSpec(w2.shape, const),
            pl.BlockSpec(b2.shape, const),
            pl.BlockSpec(w3.shape, const),
            pl.BlockSpec(b3.shape, const),
        ],
        out_specs=pl.BlockSpec((block, A), lambda i: (i, 0)),
        compiler_params=pltpu.CompilerParams(
            dimension_semantics=("parallel",),
            vmem_limit_bytes=vmem_limit_bytes,
        ),
        cost_estimate=cost,
    )(x, w1, b1, w2, b2, w3, b3)


def init_qnetwork_params(key, state_size, n_fc1, n_fc2, action_size):
    """Deterministic init mimicking nn.Linear default (U[-1/sqrt(fan_in), +1/sqrt(fan_in)]).
    Weights are stored as [in, out]."""
    ks = jax.random.split(key, 6)

    def lin(kw, kb, fan_in, fan_out):
        bound = 1.0 / jnp.sqrt(jnp.float32(fan_in))
        w = jax.random.uniform(kw, (fan_in, fan_out), jnp.float32, -bound, bound)
        b = jax.random.uniform(kb, (fan_out,), jnp.float32, -bound, bound)
        return w, b

    w1, b1 = lin(ks[0], ks[1], state_size, n_fc1)
    w2, b2 = lin(ks[2], ks[3], n_fc1, n_fc2)
    w3, b3 = lin(ks[4], ks[5], n_fc2, action_size)
    return w1, b1, w2, b2, w3, b3


def _reference_forward(x, params):
    """Pure-JAX reference using the *prepared* params (same operand dtype, f32 accumulation)."""
    w1, b1, w2, b2, w3, b3 = params
    f32 = jnp.float32
    h1 = jnp.maximum(jnp.dot(x.astype(w1.dtype), w1, preferred_element_type=f32) + b1, 0.0)
    h2 = jnp.maximum(jnp.dot(h1.astype(w2.dtype), w2, preferred_element_type=f32) + b2, 0.0)
    return jnp.dot(h2.astype(w3.dtype), w3, preferred_element_type=f32) + b3


if __name__ == "__main__":
    # LunarLander-v2: state_size=8, action_size=4; hidden sizes n_fc1=n_fc2=64.
    state_size, action_size, n_fc1, n_fc2 = 8, 4, 64, 64
    batch = 2

    key = jax.random.PRNGKey(0)
    k_x, k_p, k_big = jax.random.split(key, 3)
    raw = init_qnetwork_params(k_p, state_size, n_fc1, n_fc2, action_size)
    params = prepare_qnetwork_params(*raw)                              # one-time prep (bf16)
    f32_params = prepare_qnetwork_params(*raw, weight_dtype=jnp.float32)

    # --- small-batch path: single resident program, no grid ---
    x = jax.random.normal(k_x, (batch, state_size), jnp.float32)
    out = jax.block_until_ready(qnetwork_forward(x, params))
    assert out.shape == (batch, action_size), out.shape
    ref = _reference_forward(x, params)
    assert jnp.allclose(out, ref, atol=1e-3, rtol=1e-3), "mismatch vs bf16 reference"
    ref_f32 = _reference_forward(x, f32_params)
    assert jnp.allclose(out, ref_f32, atol=5e-2, rtol=5e-2), "mismatch vs f32 reference"

    # --- tiled path with a ragged last tile (forced small block_b to exercise it cheaply) ---
    big_b = 1030  # not a multiple of the block -> exercises Pallas's masked partial writeback
    xb = jax.random.normal(k_big, (big_b, state_size), jnp.float32)
    outb = jax.block_until_ready(qnetwork_forward(xb, params, block_b=256))
    assert outb.shape == (big_b, action_size), outb.shape
    refb = _reference_forward(xb, params)
    assert jnp.allclose(outb, refb, atol=1e-3, rtol=1e-3), "mismatch vs reference (tiled path)"

    print("KERNEL_OK")
</pallas_src>

<mosaic_0001>
module attributes {stable_mosaic.version = 11 : i64} {
  func.func @_qnet_kernel(%arg0: memref<2x8xf32, #tpu.memory_space<vmem>>, %arg1: memref<8x64xbf16, #tpu.memory_space<vmem>>, %arg2: memref<1x64xf32, #tpu.memory_space<vmem>>, %arg3: memref<64x64xbf16, #tpu.memory_space<vmem>>, %arg4: memref<1x64xf32, #tpu.memory_space<vmem>>, %arg5: memref<64x4xbf16, #tpu.memory_space<vmem>>, %arg6: memref<1x4xf32, #tpu.memory_space<vmem>>, %arg7: memref<2x4xf32, #tpu.memory_space<vmem>>) attributes {dimension_semantics = [], scalar_prefetch = 0 : i64, scratch_operands = 0 : i64, tpu.core_type = #tpu.core_type<tc>} {
    %c0 = arith.constant 0 : index
    %c0_0 = arith.constant 0 : index
    %0 = vector.load %arg0[%c0, %c0_0] : memref<2x8xf32, #tpu.memory_space<vmem>>, vector<2x8xf32>
    %1 = arith.truncf %0 : vector<2x8xf32> to vector<2x8xbf16>
    %c0_1 = arith.constant 0 : index
    %c0_2 = arith.constant 0 : index
    %2 = vector.load %arg1[%c0_1, %c0_2] : memref<8x64xbf16, #tpu.memory_space<vmem>>, vector<8x64xbf16>
    %cst = arith.constant dense<0.000000e+00> : vector<2x64xf32>
    %3 = tpu.matmul %1, %2, %cst {dimension_numbers = #tpu.dot_dimension_numbers<[1], [0], [0], [1], [0, 0, 1, 1], [], []>} : vector<2x8xbf16>, vector<8x64xbf16>, vector<2x64xf32> -> vector<2x64xf32>
    %c0_3 = arith.constant 0 : index
    %c0_4 = arith.constant 0 : index
    %4 = vector.load %arg2[%c0_3, %c0_4] : memref<1x64xf32, #tpu.memory_space<vmem>>, vector<1x64xf32>
    %5 = vector.broadcast %4 : vector<1x64xf32> to vector<2x64xf32>
    %6 = arith.addf %3, %5 : vector<2x64xf32>
    %cst_5 = arith.constant 0.000000e+00 : f32
    %7 = vector.broadcast %cst_5 : f32 to vector<2x64xf32>
    %8 = arith.maximumf %6, %7 : vector<2x64xf32>
    %9 = arith.truncf %8 : vector<2x64xf32> to vector<2x64xbf16>
    %c0_6 = arith.constant 0 : index
    %c0_7 = arith.constant 0 : index
    %10 = vector.load %arg3[%c0_6, %c0_7] : memref<64x64xbf16, #tpu.memory_space<vmem>>, vector<64x64xbf16>
    %cst_8 = arith.constant dense<0.000000e+00> : vector<2x64xf32>
    %11 = tpu.matmul %9, %10, %cst_8 {dimension_numbers = #tpu.dot_dimension_numbers<[1], [0], [0], [1], [0, 0, 1, 1], [], []>} : vector<2x64xbf16>, vector<64x64xbf16>, vector<2x64xf32> -> vector<2x64xf32>
    %c0_9 = arith.constant 0 : index
    %c0_10 = arith.constant 0 : index
    %12 = vector.load %arg4[%c0_9, %c0_10] : memref<1x64xf32, #tpu.memory_space<vmem>>, vector<1x64xf32>
    %13 = vector.broadcast %12 : vector<1x64xf32> to vector<2x64xf32>
    %14 = arith.addf %11, %13 : vector<2x64xf32>
    %cst_11 = arith.constant 0.000000e+00 : f32
    %15 = vector.broadcast %cst_11 : f32 to vector<2x64xf32>
    %16 = arith.maximumf %14, %15 : vector<2x64xf32>
    %17 = arith.truncf %16 : vector<2x64xf32> to vector<2x64xbf16>
    %c0_12 = arith.constant 0 : index
    %c0_13 = arith.constant 0 : index
    %18 = vector.load %arg5[%c0_12, %c0_13] : memref<64x4xbf16, #tpu.memory_space<vmem>>, vector<64x4xbf16>
    %cst_14 = arith.constant dense<0.000000e+00> : vector<2x4xf32>
    %19 = tpu.matmul %17, %18, %cst_14 {dimension_numbers = #tpu.dot_dimension_numbers<[1], [0], [0], [1], [0, 0, 1, 1], [], []>} : vector<2x64xbf16>, vector<64x4xbf16>, vector<2x4xf32> -> vector<2x4xf32>
    %c0_15 = arith.constant 0 : index
    %c0_16 = arith.constant 0 : index
    %20 = vector.load %arg6[%c0_15, %c0_16] : memref<1x4xf32, #tpu.memory_space<vmem>>, vector<1x4xf32>
    %21 = vector.broadcast %20 : vector<1x4xf32> to vector<2x4xf32>
    %22 = arith.addf %19, %21 : vector<2x4xf32>
    %c0_17 = arith.constant 0 : index
    %c0_18 = arith.constant 0 : index
    %23 = vector.load %arg7[%c0_17, %c0_18] : memref<2x4xf32, #tpu.memory_space<vmem>>, vector<2x4xf32>
    tpu.vector_store %arg7[%c0_17, %c0_18], %22 {strides = array<i32>} : memref<2x4xf32, #tpu.memory_space<vmem>>, vector<2x4xf32>,
    return
  }
}

</mosaic_0001>

<bundles_post_ra>
// kernel: qnetwork_forward.1
= control target key start
LH: loop header
LB: loop body
LE: loop exit
PB: predicated region body
PF: predicated region fallthrough
CT: control target
= control target key end

     0   :  { %12 = vsyncpa [#allocation3], 0  ;;  %s782_s0 = inlined_call_operand.hbm [shape: f32[2,8], index: 0, kind: input, shape index: {}]   ;;  %s783_s1 = inlined_call_operand.hbm [shape: bf16[8,64], index: 1, kind: input, shape index: {}]   ;;  %s784_s2 = inlined_call_operand.hbm [shape: f32[1,64], index: 2, kind: input, shape index: {}]   ;;  %s785_s3 = inlined_call_operand.hbm [shape: bf16[64,64], index: 3, kind: input, shape index: {}]   ;;  %s786_s4 = inlined_call_operand.hbm [shape: f32[1,64], index: 4, kind: input, shape index: {}]   ;;  %s787_s5 = inlined_call_operand.hbm [shape: bf16[64,4], index: 5, kind: input, shape index: {}]   ;;  %s788_s6 = inlined_call_operand.hbm [shape: f32[1,4], index: 6, kind: input, shape index: {}]   ;;  %s789_s7 = inlined_call_operand.hbm [shape: f32[2,4], index: 7, kind: output, shape index: {}]  }
   0x1   :  { %13 = vsyncpa [#allocation6], 0 }
   0x2   :  { %14 = vsyncpa [#allocation9], 0 }
   0x3   :  { %15 = vsyncpa [#allocation12], 0 }
   0x4   :  { %16 = vsyncpa [#allocation4], 0  ;;  %s622_s24 = smov [#allocation5]   ;;  %s623_s26 = smov [#allocation8]  }
   0x5   :  { %s33_s25 = sshll.u32 %s622_s24, 4  ;;  %s52_s27 = sshll.u32 %s623_s26, 4  ;;  %s34_s25 = int_to_ptr.vmem [resolvable:$true] %s33_s25  ;;  %s674_s27 = int_to_ptr.vmem [resolvable:$true] %s52_s27 }
   0x6   :  { %s436_s30 = scalar_lea.hbm %s783_s1, 64 }
   0x7   :  { %p437_p0 = scmp.ne.s32.totalorder %s783_s1, %s436_s30  ;;  %p440_p1 = scmp.lt.u32.totalorder %s436_s30, %s783_s1 }
   0x9   :  { %p442_p2 = pnand %p440_p1, %p437_p0 }
   0xb   :  { %445 = shalt.err (!%p442_p2)
}
   0xc   :  { %s446_s12 = scalar_lea.vmem %s34_s25, 64  ;;  %p451_p4 = scmp.lt.s32.totalorder %s34_s25, %s34_s25 }
   0xd   :  { %p447_p3 = scmp.ne.s32.totalorder %s34_s25, %s446_s12  ;;  %p452_p5 = scmp.lt.s32.totalorder %s446_s12, %s446_s12 }
   0xf   :  { %p453_p6 = por %p452_p5, %p451_p4 }
  0x11   :  { %p454_p7 = pnand %p453_p6, %p447_p3 }
  0x13   :  { %457 = shalt.err (!%p454_p7)
}
  0x14   :  { %36 = dma.hbm_to_vmem [thread:$0]  %s783_s1, 64, %s34_s25, [#allocation6]  }
  0x15   :  { %s458_s17 = scalar_lea.hbm %s785_s3, 512 }
  0x16   :  { %p459_p8 = scmp.ne.s32.totalorder %s785_s3, %s458_s17  ;;  %p462_p9 = scmp.lt.u32.totalorder %s458_s17, %s785_s3 }
  0x18   :  { %p464_p10 = pnand %p462_p9, %p459_p8 }
  0x1a   :  { %467 = shalt.err (!%p464_p10)
}
  0x1b   :  { %s468_s22 = scalar_lea.vmem %s674_s27, 512  ;;  %p473_p12 = scmp.lt.s32.totalorder %s674_s27, %s674_s27 }
  0x1c   :  { %p469_p11 = scmp.ne.s32.totalorder %s674_s27, %s468_s22  ;;  %p474_p13 = scmp.lt.s32.totalorder %s468_s22, %s468_s22 }
  0x1e   :  { %p475_p0 = por %p474_p13, %p473_p12 }
  0x20   :  { %p476_p1 = pnand %p475_p0, %p469_p11 }
  0x22   :  { %479 = shalt.err (!%p476_p1)
}
  0x23   :  { %s624_s1 = smov 64   ;;  %s625_s23 = smov 4  }
  0x24   :  { %58 = dma.hbm_to_vmem [thread:$0]  %s785_s3, 512, %s674_s27, [#allocation9], %s624_s1, %s624_s1, %s625_s23  }
  0x25   :  { %s626_s26 = smov [#allocation11]   ;;  %s627_s29 = smov [#allocation2]  }
  0x26   :  { %s74_s28 = sshll.u32 %s626_s26, 4  ;;  %s23_s30 = sshll.u32 %s627_s29, 4  ;;  %s75_s28 = int_to_ptr.vmem [resolvable:$true] %s74_s28  ;;  %s24_s30 = int_to_ptr.vmem [resolvable:$true] %s23_s30 }
  0x27   :  { %s480_s10 = scalar_lea.hbm %s787_s5, 512 }
  0x28   :  { %p481_p2 = scmp.ne.s32.totalorder %s787_s5, %s480_s10  ;;  %p484_p3 = scmp.lt.u32.totalorder %s480_s10, %s787_s5 }
  0x2a   :  { %p486_p4 = pnand %p484_p3, %p481_p2 }
  0x2c   :  { %489 = shalt.err (!%p486_p4)
}
  0x2d   :  { %s490_s3 = scalar_lea.vmem %s75_s28, 512  ;;  %p495_p6 = scmp.lt.s32.totalorder %s75_s28, %s75_s28 }
  0x2e   :  { %p491_p5 = scmp.ne.s32.totalorder %s75_s28, %s490_s3  ;;  %p496_p7 = scmp.lt.s32.totalorder %s490_s3, %s490_s3 }
  0x30   :  { %p497_p8 = por %p496_p7, %p495_p6 }
  0x32   :  { %p498_p9 = pnand %p497_p8, %p491_p5 }
  0x34   :  { %501 = shalt.err (!%p498_p9)
}
  0x35   :  { %80 = dma.hbm_to_vmem [thread:$0]  %s787_s5, 512, %s75_s28, [#allocation12], %s624_s1, %s624_s1, %s625_s23  }
  0x36   :  { %s502_s18 = scalar_lea.hbm %s782_s0, 32 }
  0x37   :  { %p503_p10 = scmp.ne.s32.totalorder %s782_s0, %s502_s18  ;;  %p506_p11 = scmp.lt.u32.totalorder %s502_s18, %s782_s0 }
  0x39   :  { %p508_p12 = pnand %p506_p11, %p503_p10 }
  0x3b   :  { %511 = shalt.err (!%p508_p12)
}
  0x3c   :  { %s512_s24 = scalar_lea.vmem %s24_s30, 32  ;;  %p517_p0 = scmp.lt.s32.totalorder %s24_s30, %s24_s30 }
  0x3d   :  { %p513_p13 = scmp.ne.s32.totalorder %s24_s30, %s512_s24  ;;  %p518_p1 = scmp.lt.s32.totalorder %s512_s24, %s512_s24 }
  0x3f   :  { %p519_p2 = por %p518_p1, %p517_p0 }
  0x41   :  { %p520_p3 = pnand %p519_p2, %p513_p13 }
  0x43   :  { %523 = shalt.err (!%p520_p3)
}
  0x44   :  { %26 = dma.hbm_to_vmem [thread:$0]  %s782_s0, 32, %s24_s30, [#allocation3]  }
  0x45   :  { %s628_s23 = smov [#allocation7]   ;;  %s629_s26 = smov [#allocation10]  }
  0x46   :  { %s43_s25 = sshll.u32 %s628_s23, 4  ;;  %s65_s28 = sshll.u32 %s629_s26, 4  ;;  %s44_s25 = int_to_ptr.vmem [resolvable:$true] %s43_s25  ;;  %s66_s28 = int_to_ptr.vmem [resolvable:$true] %s65_s28 }
  0x47   :  { %s524_s9 = scalar_lea.hbm %s784_s2, 16 }
  0x48   :  { %p525_p4 = scmp.ne.s32.totalorder %s784_s2, %s524_s9  ;;  %p528_p5 = scmp.lt.u32.totalorder %s524_s9, %s784_s2 }
  0x4a   :  { %p530_p6 = pnand %p528_p5, %p525_p4 }
  0x4c   :  { %533 = shalt.err (!%p530_p6)
}
  0x4d   :  { %s534_s0 = scalar_lea.vmem %s44_s25, 16  ;;  %s538_s30 = scalar_lea.vmem %s44_s25, 32 }
  0x4e   :  { %p535_p7 = scmp.ne.s32.totalorder %s44_s25, %s534_s0  ;;  %p539_p8 = scmp.lt.s32.totalorder %s44_s25, %s44_s25 }
  0x4f   :  { %p540_p9 = scmp.lt.s32.totalorder %s538_s30, %s534_s0 }
  0x51   :  { %p541_p10 = por %p540_p9, %p539_p8 }
  0x53   :  { %p542_p11 = pnand %p541_p10, %p535_p7 }
  0x55   :  { %545 = shalt.err (!%p542_p11)
}
  0x56   :  { %46 = dma.hbm_to_vmem [thread:$0]  %s784_s2, 16, %s44_s25, [#allocation6]  }
  0x57   :  { %s546_s16 = scalar_lea.hbm %s786_s4, 16 }
  0x58   :  { %p547_p12 = scmp.ne.s32.totalorder %s786_s4, %s546_s16  ;;  %p550_p13 = scmp.lt.u32.totalorder %s546_s16, %s786_s4 }
  0x5a   :  { %p552_p0 = pnand %p550_p13, %p547_p12 }
  0x5c   :  { %555 = shalt.err (!%p552_p0)
}
  0x5d   :  { %s556_s21 = scalar_lea.vmem %s66_s28, 16  ;;  %s560_s22 = scalar_lea.vmem %s66_s28, 32 }
  0x5e   :  { %p557_p1 = scmp.ne.s32.totalorder %s66_s28, %s556_s21  ;;  %p561_p2 = scmp.lt.s32.totalorder %s66_s28, %s66_s28 }
  0x5f   :  { %p562_p3 = scmp.lt.s32.totalorder %s560_s22, %s556_s21 }
  0x61   :  { %p563_p4 = por %p562_p3, %p561_p2 }
  0x63   :  { %p564_p5 = pnand %p563_p4, %p557_p1 }
  0x65   :  { %567 = shalt.err (!%p564_p5)
}
  0x66   :  { %68 = dma.hbm_to_vmem [thread:$0]  %s786_s4, 16, %s66_s28, [#allocation9]  }
  0x67   :  { %s630_s5 = smov [#allocation13]   ;;  %s568_s26 = scalar_lea.hbm %s788_s6, 16 }
  0x68   :  { %s87_s1 = sshll.u32 %s630_s5, 4  ;;  %p569_p6 = scmp.ne.s32.totalorder %s788_s6, %s568_s26  ;;  %s88_s1 = int_to_ptr.vmem [resolvable:$true] %s87_s1 }
  0x69   :  { %p572_p7 = scmp.lt.u32.totalorder %s568_s26, %s788_s6 }
  0x6b   :  { %p574_p8 = pnand %p572_p7, %p569_p6 }
  0x6d   :  { %577 = shalt.err (!%p574_p8)
}
  0x6e   :  { %s578_s11 = scalar_lea.vmem %s88_s1, 16  ;;  %s582_s4 = scalar_lea.vmem %s88_s1, 32 }
  0x6f   :  { %p579_p9 = scmp.ne.s32.totalorder %s88_s1, %s578_s11  ;;  %p583_p10 = scmp.lt.s32.totalorder %s88_s1, %s88_s1 }
  0x70   :  { %p584_p11 = scmp.lt.s32.totalorder %s582_s4, %s578_s11 }
  0x72   :  { %p585_p12 = por %p584_p11, %p583_p10 }
  0x74   :  { %p586_p13 = pnand %p585_p12, %p579_p9 }
  0x76   :  { %589 = shalt.err (!%p586_p13)
}
  0x77   :  { %90 = dma.hbm_to_vmem [thread:$0]  %s788_s6, 16, %s88_s1, [#allocation12]  }
  0x78   :  { %612 = dma.done.wait [#allocation3], 32  }
  0x79   :  { %613 = vsyncadd [#allocation3], 4294967264 }
  0x7a   :  { %614 = dma.done.wait [#allocation6], 80  }
  0x7b   :  { %615 = vsyncadd [#allocation6], 4294967216 }
  0x7c   :  { %616 = dma.done.wait [#allocation9], 528  }
  0x7d   :  { %617 = vsyncadd [#allocation9], 4294966768 }
  0x7e   :  { %618 = dma.done.wait [#allocation12], 528  }
  0x7f   :  { %619 = vsyncadd [#allocation12], 4294966768  ;;  %v631_v0 = vmov 0.0   ;;  %vm632_vm0 = vmmov 0   ;;  %vm127_vm1 = vcmask 1043456   ;;  %v428_v5 = vld [vmem:[#allocation8] sm:$0xff]  }
  0x80   :  { %386 = vmatprep.subr.bf16.mxu0 %v631_v0  ;;  %388 = vmatprep.mubr.msk.bf16.mxu0 %vm632_vm0, %v631_v0  ;;  %v115_v1 = vld [vmem:[#allocation5] sm:$0xf]  ;;  %v113_v2 = vld [vmem:[#allocation2] sm:$0x3]  ;;  %vm123_vm2 = vcmask 64512   ;;  %v429_v6 = vld [vmem:[#allocation8 + $0x8] sm:$0xff]  }
  0x81   :  { %392 = vmatprep.subr.bf16.mxu1 %v631_v0  ;;  %400 = vmatprep.mubr.msk.bf16.mxu1 %vm632_vm0, %v631_v0  ;;  %v129_v3 = vsel %vm127_vm1, %v115_v1, 0  ;;  %v114_v4 = vpack.c.bf16 %v113_v2, %v113_v2  ;;  %v430_v7 = vld [vmem:[#allocation8 + $0x10] sm:$0xff]   ;;  %v431_v8 = vld [vmem:[#allocation8 + $0x18] sm:$0xff]   ;;  %v432_v9 = vld [vmem:[#allocation11] sm:$0xff]   ;;  %vm212_vm3 = vcmask 523264   ;;  %s633_s6 = smov [#allocation14]  }
  0x82   :  { %387 = vmatpush3.bf16.msra.mxu0 %v129_v3  ;;  %393 = vmatpush3.bf16.msra.mxu1 %v428_v5  ;;  %v433_v10 = vld [vmem:[#allocation11 + $0x8] sm:$0xff]   ;;  %v360_v11 = vld [vmem:[#allocation7] ss:$0 sm:$0xff]  ;;  %v434_v19 = vld [vmem:[#allocation11 + $0x10] sm:$0xff]   ;;  %s348_s13 = sshll.u32 %s633_s6, 4  ;;  %vm340_vm4 = vcmask 25600   ;;  %s349_s13 = int_to_ptr.vmem [resolvable:$true] %s348_s13 }
  0x83   :  { %404 = vmatprep.subr.bf16.mxu0 %v631_v0  ;;  %394 = vmatprep.subr.bf16.mxu1 %v631_v0  ;;  %v435_v20 = vld [vmem:[#allocation11 + $0x18] sm:$0xff]   ;;  %v368_v29 = vld [vmem:[#allocation13] ss:$0 sm:$0xff]  ;;  %s590_s0 = scalar_lea.vmem %s349_s13, 32  ;;  %p595_p1 = scmp.lt.s32.totalorder %s349_s13, %s349_s13 }
  0x84   :  { %v362_v21 = vld [vmem:[#allocation10] ss:$0 sm:$0xff]  ;;  %p591_p0 = scmp.ne.s32.totalorder %s349_s13, %s590_s0  ;;  %p596_p2 = scmp.lt.s32.totalorder %s590_s0, %s590_s0 }
  0x85   :  { %389 = vmatmul.mubr.msk.bf16.vlgmr.msra.gmra.mrb[0].mxu0 %vm123_vm2, %v114_v4 }
  0x86   :  { %412 = vmatprep.mubr.msk.bf16.mxu0 %vm632_vm0, %v631_v0  ;;  %395 = vmatpush3.bf16.msra.mxu1 %v429_v6  ;;  %p597_p3 = por %p596_p2, %p595_p1 }
  0x87   :  { %396 = vmatprep.subr.bf16.mxu1 %v631_v0  ;;  %405 = vmatpush3.bf16.msra.mxu0 %v432_v9 }
  0x88   :  { %406 = vmatprep.subr.bf16.mxu0 %v631_v0  ;;  %p598_p4 = pnand %p597_p3, %p591_p0 }
  0x8a   :  { %397 = vmatpush3.bf16.msra.mxu1 %v430_v7 }
  0x8b   :  { %398 = vmatprep.subr.bf16.mxu1 %v631_v0  ;;  %407 = vmatpush3.bf16.msra.mxu0 %v433_v10 }
  0x8c   :  { %408 = vmatprep.subr.bf16.mxu0 %v631_v0 }
  0x8e   :  { %399 = vmatpush3.bf16.msra.mxu1 %v431_v8 }
  0x8f   :  { %409 = vmatpush3.bf16.msra.mxu0 %v434_v19 }
  0x90   :  { %410 = vmatprep.subr.bf16.mxu0 %v631_v0 }
  0x93   :  { %411 = vmatpush3.bf16.msra.mxu0 %v435_v20 }
 0x158   :  { %v165_v12 = vpop.f32.mrb[0].mxu0 }
 0x159   :  { %v166_v13 = vadd.f32 %v360_v11, %v165_v12  ;;  %v390_v14 = vpop.f32.mrb[1].mxu0 }
 0x15a   :  { %v168_v15 = vpop.f32.mrb[2].mxu0 }
 0x15b   :  { %v171_v16 = vmax.f32 %v166_v13, 0.0  ;;  %v391_v17 = vpop.f32.mrb[3].mxu0 }
 0x15d   :  { %v172_v18 = vpack.c.bf16 %v171_v16, %v171_v16 }
 0x15f   :  { %401 = vmatmul.mubr.msk.bf16.vlgmr.msra.gmra.mrb[0].mxu1 %vm212_vm3, %v172_v18 }
 0x232   :  { %v250_v22 = vpop.f32.mrb[0].mxu1 }
 0x233   :  { %v251_v23 = vadd.f32 %v362_v21, %v250_v22  ;;  %v402_v24 = vpop.f32.mrb[1].mxu1 }
 0x234   :  { %v253_v25 = vpop.f32.mrb[2].mxu1 }
 0x235   :  { %v256_v26 = vmax.f32 %v251_v23, 0.0  ;;  %v403_v27 = vpop.f32.mrb[3].mxu1 }
 0x237   :  { %v257_v28 = vpack.c.bf16 %v256_v26, %v256_v26 }
 0x239   :  { %413 = vmatmul.mubr.msk.bf16.vlgmr.msra.gmra.mrb[4].mxu0 %vm212_vm3, %v257_v28 }
 0x30c   :  { %v334_v30 = vpop.f32.mrb[4].mxu0 }
 0x30d   :  { %v335_v31 = vadd.f32 %v368_v29, %v334_v30  ;;  %v414_v32 = vpop.f32.mrb[5].mxu0 }
 0x30e   :  { %v337_v33 = vpop.f32.mrb[6].mxu0 }
 0x30f   :  { %v415_v34 = vpop.f32.mrb[7].mxu0  ;;  %341 = vst.msk [vmem:[#allocation14] sm:$0x3] %vm340_vm4, %v335_v31 }
 0x310   :  { %601 = shalt.err (!%p598_p4)
}
 0x311   :  { %s602_s3 = scalar_lea.hbm %s789_s7, 32 }
 0x312   :  { %p603_p5 = scmp.ne.s32.totalorder %s789_s7, %s602_s3  ;;  %p606_p6 = scmp.lt.u32.totalorder %s602_s3, %s789_s7 }
 0x314   :  { %p608_p7 = pnand %p606_p6, %p603_p5 }
 0x316   :  { %611 = shalt.err (!%p608_p7)
}
 0x317   :  { %351 = dma.vmem_to_hbm [thread:$0]  %s349_s13, 32, %s789_s7, [#allocation4]  }
 0x318   :  { %620 = dma.done.wait [#allocation4], 32  }
 0x319   :  { %621 = vsyncadd [#allocation4], 4294967264 }
 0x31a   :  { %355 = vsyncpa [#allocation3], 1 }
 0x31b   :  { %356 = vsyncpa [#allocation6], 1 }
 0x31c   :  { %357 = vsyncpa [#allocation9], 1 }
 0x31d   :  { %358 = vsyncpa [#allocation12], 1 }
 0x31e   :  { %359 = vsyncpa [#allocation4], 1 }

</bundles_post_ra>
